<compile_context>
chip_gen: v7x
topology: tpu7x:2x2x1
jax: 0.10.0
libtpu: 0.0.40
codegen_flags: <defaults>
</compile_context>

<pallas_src>
import numpy as np
import jax
import jax.numpy as jnp
from jax import lax
from jax.experimental import pallas as pl
from jax.experimental.pallas import tpu as pltpu

# ----------------------------- configuration -------------------------------
B = 8                                   # batch size
N_TEXT, N_MEDIA, N_UIMG, N_UDES = 64, 32, 32, 32
EMB_DIMS = [(10, 4), (7, 3), (5, 2)]    # (cardinality, emb_dim) per categorical feat
N_CAT = len(EMB_DIMS)
TOPIC_EMB = (60, 12)                    # topics embedding table (fixed in module)
N_TOPICS = 4                            # number of topic categorical columns
N_NUM = 16                              # numerical features
LAYERS_DIMS = [32, 24, 16]              # numcat DNN branch
EMB_LIN_OUT = 64
NUM_LIN_OUT = 64
READY_DIV = 4                           # ready_feats_divisor
OUTPUT_DIM = 8

N_READY = N_TEXT + N_MEDIA + N_UIMG + N_UDES          # 160
READY_OUT = N_READY // READY_DIV                      # 40
JOINT_OUT = READY_OUT // READY_DIV                    # 10
DIM_TOPIC_FLAT = TOPIC_EMB[1] * N_TOPICS              # 48
NUM_EMBEDS = sum(d for _, d in EMB_DIMS) + DIM_TOPIC_FLAT   # 57
NUMCAT_IN = EMB_LIN_OUT + NUM_LIN_OUT                 # 128
JOINT_IN = LAYERS_DIMS[-1] + READY_OUT                # 56

# feature index layout inside the flat input vector
TEXT_IDXS = np.arange(0, 64)
MEDIA_IDXS = np.arange(64, 96)
UIMG_IDXS = np.arange(96, 128)
UDES_IDXS = np.arange(128, 160)
CAT_IDXS = np.arange(160, 163)
TOPIC_IDXS = np.arange(163, 167)
NUM_IDXS = np.arange(167, 183)
INPUT_DIM = 183

SELU_ALPHA = 1.6732632423543772
SELU_SCALE = 1.0507009873554805
BN_EPS = 1e-5

# ------------------------ packed-parameter layout ---------------------------
PADW = 64                                   # every layer output padded to 64 lanes
_OH_CARDS = [c for c, _ in EMB_DIMS] + [TOPIC_EMB[0]] * N_TOPICS   # [10,7,5,60,60,60,60]
OH_OFFSETS = [int(v) for v in np.concatenate([[0], np.cumsum(_OH_CARDS)[:-1]])]
K_EMB_REAL = int(sum(_OH_CARDS))            # 262
K_EMB = ((K_EMB_REAL + 7) // 8) * 8         # 264
IDX_COLS = [int(c) for c in CAT_IDXS] + [int(c) for c in TOPIC_IDXS]   # 160..166

_IN_PAD = ((INPUT_DIM + 7) // 8) * 8        # 184
R_NUM = 0                                   # numeric-branch weight (rows of x)
R_RDY = R_NUM + _IN_PAD                     # 184  ready-branch weight (rows of x)
R_EMB = R_RDY + _IN_PAD                     # 368  folded embedding tables (one-hot rows)
R_W0A = R_EMB + K_EMB                       # 632  numcat layer0, num part
R_W0B = R_W0A + PADW                        # 696  numcat layer0, emb part
R_W1 = R_W0B + PADW                         # 760
R_W2 = R_W1 + PADW                          # 824
R_WJA = R_W2 + PADW                         # 888  joint, numcat part
R_WJB = R_WJA + PADW                        # 952  joint, ready part
R_WH = R_WJB + PADW                         # 1016 head
R_TOTAL = R_WH + PADW                       # 1080
N_BIAS = 8                                  # bias slab rows


# ------------------------------ activations --------------------------------
def _relu(v):
    return jnp.maximum(v, 0.0)


def _elu(v):
    # clamp exp argument: masked-out positive branch must not overflow
    return jnp.where(v > 0.0, v, jnp.exp(jnp.minimum(v, 0.0)) - 1.0)


def _selu(v):
    return SELU_SCALE * jnp.where(
        v > 0.0, v, SELU_ALPHA * (jnp.exp(jnp.minimum(v, 0.0)) - 1.0))


# ------------------------------ Pallas kernel ------------------------------
def branched_dnn_kernel(x_ref, w_ref, b_ref, out_ref):
    f32 = jnp.float32
    bs = x_ref.shape[0]
    x = x_ref[...]                                        # (B, 183)

    def mm(a, w):
        return jnp.dot(a, w, preferred_element_type=f32)

    # --- combined one-hot over all categorical / topic id columns (B, 264) ---
    iota = lax.broadcasted_iota(jnp.int32, (bs, K_EMB), 1)
    onehot = jnp.zeros((bs, K_EMB), f32)
    for col, off in zip(IDX_COLS, OH_OFFSETS):
        ids = x[:, col:col + 1].astype(jnp.int32) + off   # (B, 1)
        onehot = onehot + (iota == ids).astype(f32)

    # --- first-layer branches (BN + embedding_linear already folded) --------
    num = _relu(mm(x, w_ref[R_NUM:R_NUM + INPUT_DIM, :]) + b_ref[0:1, :])
    ready = _relu(mm(x, w_ref[R_RDY:R_RDY + INPUT_DIM, :]) + b_ref[1:2, :])
    emb = _elu(mm(onehot, w_ref[R_EMB:R_EMB + K_EMB, :]) + b_ref[2:3, :])

    # --- numcat DNN (concat replaced by summed matmuls) ----------------------
    h = _relu(mm(num, w_ref[R_W0A:R_W0A + PADW, :])
              + mm(emb, w_ref[R_W0B:R_W0B + PADW, :]) + b_ref[3:4, :])
    h = _elu(mm(h, w_ref[R_W1:R_W1 + PADW, :]) + b_ref[4:5, :])
    h = _selu(mm(h, w_ref[R_W2:R_W2 + PADW, :]) + b_ref[5:6, :])

    # --- joint + head ---------------------------------------------------------
    j = _relu(mm(h, w_ref[R_WJA:R_WJA + PADW, :])
              + mm(ready, w_ref[R_WJB:R_WJB + PADW, :]) + b_ref[6:7, :])
    o = _elu(mm(j, w_ref[R_WH:R_WH + PADW, :]) + b_ref[7:8, :])

    out_ref[...] = o[:, :OUTPUT_DIM].astype(out_ref.dtype)


# ------------------------------ parameter init ------------------------------
def _linear_init(key, fan_in, fan_out):
    kw, kb = jax.random.split(key)
    bound = 1.0 / np.sqrt(fan_in)
    w = jax.random.uniform(kw, (fan_in, fan_out), jnp.float32, -bound, bound)
    b = jax.random.uniform(kb, (1, fan_out), jnp.float32, -bound, bound)
    return w, b


def _bn_fold_init(key, dim):
    # eval-mode BatchNorm1d expressed as per-feature scale/shift
    k1, k2, k3, k4 = jax.random.split(key, 4)
    gamma = jax.random.uniform(k1, (dim,), jnp.float32, 0.5, 1.5)
    beta = jax.random.uniform(k2, (dim,), jnp.float32, -0.1, 0.1)
    r_mean = jax.random.uniform(k3, (dim,), jnp.float32, -0.1, 0.1)
    r_var = jax.random.uniform(k4, (dim,), jnp.float32, 0.5, 1.5)
    scale = gamma / jnp.sqrt(r_var + BN_EPS)
    shift = beta - r_mean * scale
    return scale.reshape(1, dim), shift.reshape(1, dim)


def init_params(key):
    keys = jax.random.split(key, 32)
    p = {}
    p["emb_tables"] = [
        jax.random.normal(keys[i], (card, dim), jnp.float32)
        for i, (card, dim) in enumerate(EMB_DIMS)
    ]
    p["topic_table"] = jax.random.normal(keys[3], TOPIC_EMB, jnp.float32)

    p["we"], p["be"] = _linear_init(keys[4], NUM_EMBEDS, EMB_LIN_OUT)
    p["wn"], p["bn"] = _linear_init(keys[5], N_NUM, NUM_LIN_OUT)

    p["wr"], p["br"] = _linear_init(keys[6], N_READY, READY_OUT)
    p["sr"], p["tr"] = _bn_fold_init(keys[7], READY_OUT)

    dims_in = [NUMCAT_IN] + LAYERS_DIMS[:-1]
    for i, (di, do) in enumerate(zip(dims_in, LAYERS_DIMS)):
        p[f"w{i}"], p[f"b{i}"] = _linear_init(keys[8 + 2 * i], di, do)
        p[f"s{i}"], p[f"t{i}"] = _bn_fold_init(keys[9 + 2 * i], do)

    p["wj"], p["bj"] = _linear_init(keys[20], JOINT_IN, JOINT_OUT)
    p["sj"], p["tj"] = _bn_fold_init(keys[21], JOINT_OUT)

    p["wh"], p["bh"] = _linear_init(keys[22], JOINT_OUT, OUTPUT_DIM)
    p["sh"], p["th"] = _bn_fold_init(keys[23], OUTPUT_DIM)
    return p


# --------------------------- parameter packing ------------------------------
def pack_params(p):
    """Fold BN + embedding_linear and pack everything into two f32 slabs."""
    hp = jax.lax.Precision.HIGHEST
    W = jnp.zeros((R_TOTAL, PADW), jnp.float32)
    Bv = jnp.zeros((N_BIAS, PADW), jnp.float32)

    def put_w(Wm, r0, mat):
        k, n = mat.shape
        return Wm.at[r0:r0 + k, :n].set(mat)

    def put_b(Bm, i, vec):
        v = jnp.asarray(vec).reshape(-1)
        return Bm.at[i, :v.shape[0]].set(v)

    # numeric branch: weight rows live only at the NUM_IDXS columns of x
    W = W.at[R_NUM + int(NUM_IDXS[0]):R_NUM + int(NUM_IDXS[-1]) + 1,
             :NUM_LIN_OUT].set(p["wn"])
    Bv = put_b(Bv, 0, p["bn"])

    # ready branch: Linear over x[:, 0:160] with BatchNorm folded in
    wr_f = p["wr"] * p["sr"]
    br_f = p["br"] * p["sr"] + p["tr"]
    W = W.at[R_RDY:R_RDY + N_READY, :READY_OUT].set(wr_f)
    Bv = put_b(Bv, 1, br_f)

    # embedding branch: fold each table through its block of embedding_linear
    we = p["we"]                                          # (57, 64)
    blocks, off = [], 0
    for t, (_, dim) in enumerate(EMB_DIMS):
        blocks.append(jnp.matmul(p["emb_tables"][t], we[off:off + dim, :],
                                 precision=hp))
        off += dim
    for _ in range(N_TOPICS):
        blocks.append(jnp.matmul(p["topic_table"], we[off:off + TOPIC_EMB[1], :],
                                 precision=hp))
        off += TOPIC_EMB[1]
    emb_fold = jnp.concatenate(blocks, axis=0)            # (262, 64)
    W = W.at[R_EMB:R_EMB + K_EMB_REAL, :EMB_LIN_OUT].set(emb_fold)
    Bv = put_b(Bv, 2, p["be"])

    # numcat block 0 (rows split: [num | emb]), BN folded
    w0f = p["w0"] * p["s0"]
    b0f = p["b0"] * p["s0"] + p["t0"]
    W = put_w(W, R_W0A, w0f[:NUM_LIN_OUT])
    W = put_w(W, R_W0B, w0f[NUM_LIN_OUT:])
    Bv = put_b(Bv, 3, b0f)

    # numcat blocks 1 / 2
    w1f = p["w1"] * p["s1"]; b1f = p["b1"] * p["s1"] + p["t1"]
    W = put_w(W, R_W1, w1f); Bv = put_b(Bv, 4, b1f)
    w2f = p["w2"] * p["s2"]; b2f = p["b2"] * p["s2"] + p["t2"]
    W = put_w(W, R_W2, w2f); Bv = put_b(Bv, 5, b2f)

    # joint (rows split: [numcat_out | ready_out]) and head, BN folded
    wjf = p["wj"] * p["sj"]; bjf = p["bj"] * p["sj"] + p["tj"]
    W = put_w(W, R_WJA, wjf[:LAYERS_DIMS[-1]])
    W = put_w(W, R_WJB, wjf[LAYERS_DIMS[-1]:])
    Bv = put_b(Bv, 6, bjf)
    whf = p["wh"] * p["sh"]; bhf = p["bh"] * p["sh"] + p["th"]
    W = put_w(W, R_WH, whf); Bv = put_b(Bv, 7, bhf)

    return W, Bv


# ------------------------------ forward wrapper ------------------------------
@jax.jit
def branched_dnn_forward(x, w_slab, b_slab):
    vmem = pl.BlockSpec(memory_space=pltpu.MemorySpace.VMEM)
    return pl.pallas_call(
        branched_dnn_kernel,
        out_shape=jax.ShapeDtypeStruct((x.shape[0], OUTPUT_DIM), jnp.float32),
        in_specs=[vmem, vmem, vmem],
        out_specs=vmem,
    )(x, w_slab, b_slab)
    # TODO(synk): if this is ever run with large serving batches, add a batch
    # grid axis with dimension_semantics=("parallel",) to use both v7x TCs.


# ------------------------------ pure-JAX reference ---------------------------
def _prepare_inputs(x, p):
    """Reference-side feature slicing and embedding gathers (unfused)."""
    bs = x.shape[0]
    x_ready = jnp.concatenate(
        [x[:, TEXT_IDXS], x[:, MEDIA_IDXS], x[:, UIMG_IDXS], x[:, UDES_IDXS]],
        axis=1)
    x_num = x[:, NUM_IDXS]
    x_cat = x[:, CAT_IDXS].astype(jnp.int32)
    x_top = x[:, TOPIC_IDXS].astype(jnp.int32)
    emb_list = [jnp.take(p["emb_tables"][i], x_cat[:, i], axis=0) for i in range(N_CAT)]
    top_emb = jnp.take(p["topic_table"], x_top, axis=0).reshape(bs, DIM_TOPIC_FLAT)
    x_emb = jnp.concatenate(emb_list + [top_emb], axis=1)
    return x_num, x_emb, x_ready


def reference_forward(x, p):
    x_num, x_emb, x_ready = _prepare_inputs(x, p)
    emb = _elu(x_emb @ p["we"] + p["be"])
    num = _relu(x_num @ p["wn"] + p["bn"])
    ready = _relu((x_ready @ p["wr"] + p["br"]) * p["sr"] + p["tr"])
    h = jnp.concatenate([num, emb], axis=1)
    h = _relu((h @ p["w0"] + p["b0"]) * p["s0"] + p["t0"])
    h = _elu((h @ p["w1"] + p["b1"]) * p["s1"] + p["t1"])
    h = _selu((h @ p["w2"] + p["b2"]) * p["s2"] + p["t2"])
    j = jnp.concatenate([h, ready], axis=1)
    j = _relu((j @ p["wj"] + p["bj"]) * p["sj"] + p["tj"])
    return _elu((j @ p["wh"] + p["bh"]) * p["sh"] + p["th"])


# ----------------------------------- main ------------------------------------
if __name__ == "__main__":
    key = jax.random.PRNGKey(0)
    k_params, k_cont, k_c0, k_c1, k_c2, k_top = jax.random.split(key, 6)

    params = init_params(k_params)
    w_slab, b_slab = pack_params(params)

    # flat input: continuous features ~ N(0,1); categorical / topic columns
    # hold integer ids stored as floats.
    x = jax.random.normal(k_cont, (B, INPUT_DIM), jnp.float32)
    cat_cols = jnp.stack(
        [
            jax.random.randint(k_c0, (B,), 0, EMB_DIMS[0][0]),
            jax.random.randint(k_c1, (B,), 0, EMB_DIMS[1][0]),
            jax.random.randint(k_c2, (B,), 0, EMB_DIMS[2][0]),
        ],
        axis=1,
    ).astype(jnp.float32)
    topic_cols = jax.random.randint(k_top, (B, N_TOPICS), 0, TOPIC_EMB[0]).astype(jnp.float32)
    x = x.at[:, CAT_IDXS].set(cat_cols)
    x = x.at[:, TOPIC_IDXS].set(topic_cols)

    out = branched_dnn_forward(x, w_slab, b_slab)
    out = jax.block_until_ready(out)

    ref = reference_forward(x, params)
    np.testing.assert_allclose(np.asarray(out), np.asarray(ref), rtol=2e-4, atol=2e-4)

    print("KERNEL_OK")
</pallas_src>

<mosaic_0001>
module attributes {stable_mosaic.version = 11 : i64} {
  func.func @branched_dnn_kernel(%arg0: memref<8x183xf32, #tpu.memory_space<vmem>>, %arg1: memref<1080x64xf32, #tpu.memory_space<vmem>>, %arg2: memref<8x64xf32, #tpu.memory_space<vmem>>, %arg3: memref<8x8xf32, #tpu.memory_space<vmem>>) attributes {dimension_semantics = [], scalar_prefetch = 0 : i64, scratch_operands = 0 : i64, tpu.core_type = #tpu.core_type<tc>} {
    %c0 = arith.constant 0 : index
    %c0_0 = arith.constant 0 : index
    %0 = vector.load %arg0[%c0, %c0_0] : memref<8x183xf32, #tpu.memory_space<vmem>>, vector<8x183xf32>
    %1 = tpu.iota {dimensions = array<i32: 1>} : vector<8x264xi32>
    %cst = arith.constant 0.000000e+00 : f32
    %2 = vector.broadcast %cst : f32 to vector<8x264xf32>
    %3 = vector.extract_strided_slice %0 {offsets = [0, 160], sizes = [8, 1], strides = [1, 1]} : vector<8x183xf32> to vector<8x1xf32>
    %4 = arith.fptosi %3 : vector<8x1xf32> to vector<8x1xi32>
    %c0_i32 = arith.constant 0 : i32
    %5 = vector.broadcast %c0_i32 : i32 to vector<8x1xi32>
    %6 = arith.addi %4, %5 : vector<8x1xi32>
    %7 = vector.broadcast %6 : vector<8x1xi32> to vector<8x264xi32>
    %8 = arith.cmpi eq, %1, %7 : vector<8x264xi32>
    %9 = arith.extui %8 : vector<8x264xi1> to vector<8x264xi32>
    %10 = arith.sitofp %9 : vector<8x264xi32> to vector<8x264xf32>
    %11 = arith.addf %2, %10 : vector<8x264xf32>
    %12 = vector.extract_strided_slice %0 {offsets = [0, 161], sizes = [8, 1], strides = [1, 1]} : vector<8x183xf32> to vector<8x1xf32>
    %13 = arith.fptosi %12 : vector<8x1xf32> to vector<8x1xi32>
    %c10_i32 = arith.constant 10 : i32
    %14 = vector.broadcast %c10_i32 : i32 to vector<8x1xi32>
    %15 = arith.addi %13, %14 : vector<8x1xi32>
    %16 = vector.broadcast %15 : vector<8x1xi32> to vector<8x264xi32>
    %17 = arith.cmpi eq, %1, %16 : vector<8x264xi32>
    %18 = arith.extui %17 : vector<8x264xi1> to vector<8x264xi32>
    %19 = arith.sitofp %18 : vector<8x264xi32> to vector<8x264xf32>
    %20 = arith.addf %11, %19 : vector<8x264xf32>
    %21 = vector.extract_strided_slice %0 {offsets = [0, 162], sizes = [8, 1], strides = [1, 1]} : vector<8x183xf32> to vector<8x1xf32>
    %22 = arith.fptosi %21 : vector<8x1xf32> to vector<8x1xi32>
    %c17_i32 = arith.constant 17 : i32
    %23 = vector.broadcast %c17_i32 : i32 to vector<8x1xi32>
    %24 = arith.addi %22, %23 : vector<8x1xi32>
    %25 = vector.broadcast %24 : vector<8x1xi32> to vector<8x264xi32>
    %26 = arith.cmpi eq, %1, %25 : vector<8x264xi32>
    %27 = arith.extui %26 : vector<8x264xi1> to vector<8x264xi32>
    %28 = arith.sitofp %27 : vector<8x264xi32> to vector<8x264xf32>
    %29 = arith.addf %20, %28 : vector<8x264xf32>
    %30 = vector.extract_strided_slice %0 {offsets = [0, 163], sizes = [8, 1], strides = [1, 1]} : vector<8x183xf32> to vector<8x1xf32>
    %31 = arith.fptosi %30 : vector<8x1xf32> to vector<8x1xi32>
    %c22_i32 = arith.constant 22 : i32
    %32 = vector.broadcast %c22_i32 : i32 to vector<8x1xi32>
    %33 = arith.addi %31, %32 : vector<8x1xi32>
    %34 = vector.broadcast %33 : vector<8x1xi32> to vector<8x264xi32>
    %35 = arith.cmpi eq, %1, %34 : vector<8x264xi32>
    %36 = arith.extui %35 : vector<8x264xi1> to vector<8x264xi32>
    %37 = arith.sitofp %36 : vector<8x264xi32> to vector<8x264xf32>
    %38 = arith.addf %29, %37 : vector<8x264xf32>
    %39 = vector.extract_strided_slice %0 {offsets = [0, 164], sizes = [8, 1], strides = [1, 1]} : vector<8x183xf32> to vector<8x1xf32>
    %40 = arith.fptosi %39 : vector<8x1xf32> to vector<8x1xi32>
    %c82_i32 = arith.constant 82 : i32
    %41 = vector.broadcast %c82_i32 : i32 to vector<8x1xi32>
    %42 = arith.addi %40, %41 : vector<8x1xi32>
    %43 = vector.broadcast %42 : vector<8x1xi32> to vector<8x264xi32>
    %44 = arith.cmpi eq, %1, %43 : vector<8x264xi32>
    %45 = arith.extui %44 : vector<8x264xi1> to vector<8x264xi32>
    %46 = arith.sitofp %45 : vector<8x264xi32> to vector<8x264xf32>
    %47 = arith.addf %38, %46 : vector<8x264xf32>
    %48 = vector.extract_strided_slice %0 {offsets = [0, 165], sizes = [8, 1], strides = [1, 1]} : vector<8x183xf32> to vector<8x1xf32>
    %49 = arith.fptosi %48 : vector<8x1xf32> to vector<8x1xi32>
    %c142_i32 = arith.constant 142 : i32
    %50 = vector.broadcast %c142_i32 : i32 to vector<8x1xi32>
    %51 = arith.addi %49, %50 : vector<8x1xi32>
    %52 = vector.broadcast %51 : vector<8x1xi32> to vector<8x264xi32>
    %53 = arith.cmpi eq, %1, %52 : vector<8x264xi32>
    %54 = arith.extui %53 : vector<8x264xi1> to vector<8x264xi32>
    %55 = arith.sitofp %54 : vector<8x264xi32> to vector<8x264xf32>
    %56 = arith.addf %47, %55 : vector<8x264xf32>
    %57 = vector.extract_strided_slice %0 {offsets = [0, 166], sizes = [8, 1], strides = [1, 1]} : vector<8x183xf32> to vector<8x1xf32>
    %58 = arith.fptosi %57 : vector<8x1xf32> to vector<8x1xi32>
    %c202_i32 = arith.constant 202 : i32
    %59 = vector.broadcast %c202_i32 : i32 to vector<8x1xi32>
    %60 = arith.addi %58, %59 : vector<8x1xi32>
    %61 = vector.broadcast %60 : vector<8x1xi32> to vector<8x264xi32>
    %62 = arith.cmpi eq, %1, %61 : vector<8x264xi32>
    %63 = arith.extui %62 : vector<8x264xi1> to vector<8x264xi32>
    %64 = arith.sitofp %63 : vector<8x264xi32> to vector<8x264xf32>
    %65 = arith.addf %56, %64 : vector<8x264xf32>
    %c0_1 = arith.constant 0 : index
    %c0_2 = arith.constant 0 : index
    %66 = vector.load %arg1[%c0_1, %c0_2] : memref<1080x64xf32, #tpu.memory_space<vmem>>, vector<183x64xf32>
    %cst_3 = arith.constant dense<0.000000e+00> : vector<8x64xf32>
    %67 = tpu.matmul %0, %66, %cst_3 {dimension_numbers = #tpu.dot_dimension_numbers<[1], [0], [0], [1], [0, 0, 1, 1], [], []>} : vector<8x183xf32>, vector<183x64xf32>, vector<8x64xf32> -> vector<8x64xf32>
    %c0_4 = arith.constant 0 : index
    %c0_5 = arith.constant 0 : index
    %68 = vector.load %arg2[%c0_4, %c0_5] : memref<8x64xf32, #tpu.memory_space<vmem>>, vector<1x64xf32>
    %69 = vector.broadcast %68 : vector<1x64xf32> to vector<8x64xf32>
    %70 = arith.addf %67, %69 : vector<8x64xf32>
    %cst_6 = arith.constant 0.000000e+00 : f32
    %71 = vector.broadcast %cst_6 : f32 to vector<8x64xf32>
    %72 = arith.maximumf %70, %71 : vector<8x64xf32>
    %c184 = arith.constant 184 : index
    %c0_7 = arith.constant 0 : index
    %73 = vector.load %arg1[%c184, %c0_7] : memref<1080x64xf32, #tpu.memory_space<vmem>>, vector<183x64xf32>
    %cst_8 = arith.constant dense<0.000000e+00> : vector<8x64xf32>
    %74 = tpu.matmul %0, %73, %cst_8 {dimension_numbers = #tpu.dot_dimension_numbers<[1], [0], [0], [1], [0, 0, 1, 1], [], []>} : vector<8x183xf32>, vector<183x64xf32>, vector<8x64xf32> -> vector<8x64xf32>
    %c1 = arith.constant 1 : index
    %c0_9 = arith.constant 0 : index
    %75 = vector.load %arg2[%c1, %c0_9] : memref<8x64xf32, #tpu.memory_space<vmem>>, vector<1x64xf32>
    %76 = vector.broadcast %75 : vector<1x64xf32> to vector<8x64xf32>
    %77 = arith.addf %74, %76 : vector<8x64xf32>
    %cst_10 = arith.constant 0.000000e+00 : f32
    %78 = vector.broadcast %cst_10 : f32 to vector<8x64xf32>
    %79 = arith.maximumf %77, %78 : vector<8x64xf32>
    %c368 = arith.constant 368 : index
    %c0_11 = arith.constant 0 : index
    %80 = vector.load %arg1[%c368, %c0_11] : memref<1080x64xf32, #tpu.memory_space<vmem>>, vector<264x64xf32>
    %cst_12 = arith.constant dense<0.000000e+00> : vector<8x64xf32>
    %81 = tpu.matmul %65, %80, %cst_12 {dimension_numbers = #tpu.dot_dimension_numbers<[1], [0], [0], [1], [0, 0, 1, 1], [], []>} : vector<8x264xf32>, vector<264x64xf32>, vector<8x64xf32> -> vector<8x64xf32>
    %c2 = arith.constant 2 : index
    %c0_13 = arith.constant 0 : index
    %82 = vector.load %arg2[%c2, %c0_13] : memref<8x64xf32, #tpu.memory_space<vmem>>, vector<1x64xf32>
    %83 = vector.broadcast %82 : vector<1x64xf32> to vector<8x64xf32>
    %84 = arith.addf %81, %83 : vector<8x64xf32>
    %cst_14 = arith.constant 0.000000e+00 : f32
    %85 = vector.broadcast %cst_14 : f32 to vector<8x64xf32>
    %86 = arith.cmpf ogt, %84, %85 : vector<8x64xf32>
    %cst_15 = arith.constant 0.000000e+00 : f32
    %87 = vector.broadcast %cst_15 : f32 to vector<8x64xf32>
    %88 = arith.minimumf %84, %87 : vector<8x64xf32>
    %89 = math.exp %88 : vector<8x64xf32>
    %cst_16 = arith.constant 1.000000e+00 : f32
    %90 = vector.broadcast %cst_16 : f32 to vector<8x64xf32>
    %91 = arith.subf %89, %90 : vector<8x64xf32>
    %92 = arith.select %86, %84, %91 : vector<8x64xi1>, vector<8x64xf32>
    %c632 = arith.constant 632 : index
    %c0_17 = arith.constant 0 : index
    %93 = vector.load %arg1[%c632, %c0_17] : memref<1080x64xf32, #tpu.memory_space<vmem>>, vector<64x64xf32>
    %cst_18 = arith.constant dense<0.000000e+00> : vector<8x64xf32>
    %94 = tpu.matmul %72, %93, %cst_18 {dimension_numbers = #tpu.dot_dimension_numbers<[1], [0], [0], [1], [0, 0, 1, 1], [], []>} : vector<8x64xf32>, vector<64x64xf32>, vector<8x64xf32> -> vector<8x64xf32>
    %c696 = arith.constant 696 : index
    %c0_19 = arith.constant 0 : index
    %95 = vector.load %arg1[%c696, %c0_19] : memref<1080x64xf32, #tpu.memory_space<vmem>>, vector<64x64xf32>
    %cst_20 = arith.constant dense<0.000000e+00> : vector<8x64xf32>
    %96 = tpu.matmul %92, %95, %cst_20 {dimension_numbers = #tpu.dot_dimension_numbers<[1], [0], [0], [1], [0, 0, 1, 1], [], []>} : vector<8x64xf32>, vector<64x64xf32>, vector<8x64xf32> -> vector<8x64xf32>
    %97 = arith.addf %94, %96 : vector<8x64xf32>
    %c3 = arith.constant 3 : index
    %c0_21 = arith.constant 0 : index
    %98 = vector.load %arg2[%c3, %c0_21] : memref<8x64xf32, #tpu.memory_space<vmem>>, vector<1x64xf32>
    %99 = vector.broadcast %98 : vector<1x64xf32> to vector<8x64xf32>
    %100 = arith.addf %97, %99 : vector<8x64xf32>
    %cst_22 = arith.constant 0.000000e+00 : f32
    %101 = vector.broadcast %cst_22 : f32 to vector<8x64xf32>
    %102 = arith.maximumf %100, %101 : vector<8x64xf32>
    %c760 = arith.constant 760 : index
    %c0_23 = arith.constant 0 : index
    %103 = vector.load %arg1[%c760, %c0_23] : memref<1080x64xf32, #tpu.memory_space<vmem>>, vector<64x64xf32>
    %cst_24 = arith.constant dense<0.000000e+00> : vector<8x64xf32>
    %104 = tpu.matmul %102, %103, %cst_24 {dimension_numbers = #tpu.dot_dimension_numbers<[1], [0], [0], [1], [0, 0, 1, 1], [], []>} : vector<8x64xf32>, vector<64x64xf32>, vector<8x64xf32> -> vector<8x64xf32>
    %c4 = arith.constant 4 : index
    %c0_25 = arith.constant 0 : index
    %105 = vector.load %arg2[%c4, %c0_25] : memref<8x64xf32, #tpu.memory_space<vmem>>, vector<1x64xf32>
    %106 = vector.broadcast %105 : vector<1x64xf32> to vector<8x64xf32>
    %107 = arith.addf %104, %106 : vector<8x64xf32>
    %cst_26 = arith.constant 0.000000e+00 : f32
    %108 = vector.broadcast %cst_26 : f32 to vector<8x64xf32>
    %109 = arith.cmpf ogt, %107, %108 : vector<8x64xf32>
    %cst_27 = arith.constant 0.000000e+00 : f32
    %110 = vector.broadcast %cst_27 : f32 to vector<8x64xf32>
    %111 = arith.minimumf %107, %110 : vector<8x64xf32>
    %112 = math.exp %111 : vector<8x64xf32>
    %cst_28 = arith.constant 1.000000e+00 : f32
    %113 = vector.broadcast %cst_28 : f32 to vector<8x64xf32>
    %114 = arith.subf %112, %113 : vector<8x64xf32>
    %115 = arith.select %109, %107, %114 : vector<8x64xi1>, vector<8x64xf32>
    %c824 = arith.constant 824 : index
    %c0_29 = arith.constant 0 : index
    %116 = vector.load %arg1[%c824, %c0_29] : memref<1080x64xf32, #tpu.memory_space<vmem>>, vector<64x64xf32>
    %cst_30 = arith.constant dense<0.000000e+00> : vector<8x64xf32>
    %117 = tpu.matmul %115, %116, %cst_30 {dimension_numbers = #tpu.dot_dimension_numbers<[1], [0], [0], [1], [0, 0, 1, 1], [], []>} : vector<8x64xf32>, vector<64x64xf32>, vector<8x64xf32> -> vector<8x64xf32>
    %c5 = arith.constant 5 : index
    %c0_31 = arith.constant 0 : index
    %118 = vector.load %arg2[%c5, %c0_31] : memref<8x64xf32, #tpu.memory_space<vmem>>, vector<1x64xf32>
    %119 = vector.broadcast %118 : vector<1x64xf32> to vector<8x64xf32>
    %120 = arith.addf %117, %119 : vector<8x64xf32>
    %cst_32 = arith.constant 0.000000e+00 : f32
    %121 = vector.broadcast %cst_32 : f32 to vector<8x64xf32>
    %122 = arith.cmpf ogt, %120, %121 : vector<8x64xf32>
    %cst_33 = arith.constant 0.000000e+00 : f32
    %123 = vector.broadcast %cst_33 : f32 to vector<8x64xf32>
    %124 = arith.minimumf %120, %123 : vector<8x64xf32>
    %125 = math.exp %124 : vector<8x64xf32>
    %cst_34 = arith.constant 1.000000e+00 : f32
    %126 = vector.broadcast %cst_34 : f32 to vector<8x64xf32>
    %127 = arith.subf %125, %126 : vector<8x64xf32>
    %cst_35 = arith.constant 1.67326319 : f32
    %128 = vector.broadcast %cst_35 : f32 to vector<8x64xf32>
    %129 = arith.mulf %128, %127 : vector<8x64xf32>
    %130 = arith.select %122, %120, %129 : vector<8x64xi1>, vector<8x64xf32>
    %cst_36 = arith.constant 1.05070102 : f32
    %131 = vector.broadcast %cst_36 : f32 to vector<8x64xf32>
    %132 = arith.mulf %131, %130 : vector<8x64xf32>
    %c888 = arith.constant 888 : index
    %c0_37 = arith.constant 0 : index
    %133 = vector.load %arg1[%c888, %c0_37] : memref<1080x64xf32, #tpu.memory_space<vmem>>, vector<64x64xf32>
    %cst_38 = arith.constant dense<0.000000e+00> : vector<8x64xf32>
    %134 = tpu.matmul %132, %133, %cst_38 {dimension_numbers = #tpu.dot_dimension_numbers<[1], [0], [0], [1], [0, 0, 1, 1], [], []>} : vector<8x64xf32>, vector<64x64xf32>, vector<8x64xf32> -> vector<8x64xf32>
    %c952 = arith.constant 952 : index
    %c0_39 = arith.constant 0 : index
    %135 = vector.load %arg1[%c952, %c0_39] : memref<1080x64xf32, #tpu.memory_space<vmem>>, vector<64x64xf32>
    %cst_40 = arith.constant dense<0.000000e+00> : vector<8x64xf32>
    %136 = tpu.matmul %79, %135, %cst_40 {dimension_numbers = #tpu.dot_dimension_numbers<[1], [0], [0], [1], [0, 0, 1, 1], [], []>} : vector<8x64xf32>, vector<64x64xf32>, vector<8x64xf32> -> vector<8x64xf32>
    %137 = arith.addf %134, %136 : vector<8x64xf32>
    %c6 = arith.constant 6 : index
    %c0_41 = arith.constant 0 : index
    %138 = vector.load %arg2[%c6, %c0_41] : memref<8x64xf32, #tpu.memory_space<vmem>>, vector<1x64xf32>
    %139 = vector.broadcast %138 : vector<1x64xf32> to vector<8x64xf32>
    %140 = arith.addf %137, %139 : vector<8x64xf32>
    %cst_42 = arith.constant 0.000000e+00 : f32
    %141 = vector.broadcast %cst_42 : f32 to vector<8x64xf32>
    %142 = arith.maximumf %140, %141 : vector<8x64xf32>
    %c1016 = arith.constant 1016 : index
    %c0_43 = arith.constant 0 : index
    %143 = vector.load %arg1[%c1016, %c0_43] : memref<1080x64xf32, #tpu.memory_space<vmem>>, vector<64x64xf32>
    %cst_44 = arith.constant dense<0.000000e+00> : vector<8x64xf32>
    %144 = tpu.matmul %142, %143, %cst_44 {dimension_numbers = #tpu.dot_dimension_numbers<[1], [0], [0], [1], [0, 0, 1, 1], [], []>} : vector<8x64xf32>, vector<64x64xf32>, vector<8x64xf32> -> vector<8x64xf32>
    %c7 = arith.constant 7 : index
    %c0_45 = arith.constant 0 : index
    %145 = vector.load %arg2[%c7, %c0_45] : memref<8x64xf32, #tpu.memory_space<vmem>>, vector<1x64xf32>
    %146 = vector.broadcast %145 : vector<1x64xf32> to vector<8x64xf32>
    %147 = arith.addf %144, %146 : vector<8x64xf32>
    %cst_46 = arith.constant 0.000000e+00 : f32
    %148 = vector.broadcast %cst_46 : f32 to vector<8x64xf32>
    %149 = arith.cmpf ogt, %147, %148 : vector<8x64xf32>
    %cst_47 = arith.constant 0.000000e+00 : f32
    %150 = vector.broadcast %cst_47 : f32 to vector<8x64xf32>
    %151 = arith.minimumf %147, %150 : vector<8x64xf32>
    %152 = math.exp %151 : vector<8x64xf32>
    %cst_48 = arith.constant 1.000000e+00 : f32
    %153 = vector.broadcast %cst_48 : f32 to vector<8x64xf32>
    %154 = arith.subf %152, %153 : vector<8x64xf32>
    %155 = arith.select %149, %147, %154 : vector<8x64xi1>, vector<8x64xf32>
    %156 = vector.extract_strided_slice %155 {offsets = [0, 0], sizes = [8, 8], strides = [1, 1]} : vector<8x64xf32> to vector<8x8xf32>
    %c0_49 = arith.constant 0 : index
    %c0_50 = arith.constant 0 : index
    %157 = vector.load %arg3[%c0_49, %c0_50] : memref<8x8xf32, #tpu.memory_space<vmem>>, vector<8x8xf32>
    tpu.vector_store %arg3[%c0_49, %c0_50], %156 {strides = array<i32>} : memref<8x8xf32, #tpu.memory_space<vmem>>, vector<8x8xf32>,
    return
  }
}

</mosaic_0001>

<bundles_post_ra>
// kernel: branched_dnn_forward.1
= control target key start
LH: loop header
LB: loop body
LE: loop exit
PB: predicated region body
PF: predicated region fallthrough
CT: control target
= control target key end

     0   :  { %v1680_v2 = vmov 32   ;;  %v1681_v4 = vmov 34   ;;  %v1682_v10 = vmov 0.0|0.0   ;;  %vm161_vm0 = vcmask 449536   ;;  %s2291_s0 = inlined_call_operand.vmem [shape: f32[8,183], index: 0, kind: input, shape index: {}]   ;;  %s2292_s1 = inlined_call_operand.vmem [shape: f32[1080,64], index: 1, kind: input, shape index: {}]   ;;  %s2293_s2 = inlined_call_operand.vmem [shape: f32[8,64], index: 2, kind: input, shape index: {}]   ;;  %s2294_s3 = inlined_call_operand.hbm [shape: f32[8,8], index: 3, kind: output, shape index: {}]  }
   0x1   :  { %v16_v0 = vld [vmem:[%s2291_s0 + $0x8] sm:$0xff]  ;;  %v133_v1 = vld [vmem:[%s2292_s1] sm:$0xff]  ;;  %1640 = vset.pattern.permute.xlu0 %v1680_v2  ;;  %1642 = vset.pattern.permute.xlu1 %v1681_v4  ;;  %v135_v6 = vld [vmem:[%s2292_s1 + $0x10] sm:$0xff]  ;;  %v1683_v23 = vmov 33   ;;  %v1684_v27 = vmov 35   ;;  %v1685_v35 = vmov 37  }
   0x2   :  { %v1627_v3 = vtrunc.f32 %v16_v0  ;;  %v134_v5 = vld [vmem:[%s2292_s1 + $0x8] sm:$0xff]  ;;  %v136_v7 = vld [vmem:[%s2292_s1 + $0x18] sm:$0xff]  ;;  %1445 = vmatprep.subr.bf16.mxu0 %v1682_v10  ;;  %1478 = vmatprep.subr.bf16.mxu1 %v1682_v10  ;;  %v137_v13 = vld [vmem:[%s2292_s1 + $0x20] sm:$0xff]  ;;  %v1686_v39 = vmov 36   ;;  %v1687_v47 = vmov 38  }
   0x3   :  { %v1446_v8 = vpack.c.bf16 %v134_v5, %v133_v1  ;;  %v1449_v11 = vpack.c.bf16 %v136_v7, %v135_v6  ;;  %1185 = vmatprep.mubr.msk.f32.mxu0 %vm161_vm0, %v16_v0  ;;  %v138_v14 = vld [vmem:[%s2292_s1 + $0x28] sm:$0xff]  ;;  %v240_v15 = vld [vmem:[%s2292_s1 + $0xb8] sm:$0xff]  ;;  %v241_v17 = vld [vmem:[%s2292_s1 + $0xc0] sm:$0xff]  ;;  %1188 = vmatprep.mubr.msk.f32.mxu1 %vm161_vm0, %v16_v0 }
   0x4   :  { %v1628_v9 = vcvt.f32.s32 %v1627_v3  ;;  %v1479_v18 = vpack.c.bf16 %v241_v17, %v240_v15  ;;  %v242_v19 = vld [vmem:[%s2292_s1 + $0xc8] sm:$0xff]  ;;  %v243_v20 = vld [vmem:[%s2292_s1 + $0xd0] sm:$0xff]  ;;  %v1452_v22 = vpack.c.bf16 %v138_v14, %v137_v13  ;;  %v140_v25 = vld [vmem:[%s2292_s1 + $0x38] sm:$0xff] }
   0x5   :  { %1447 = vmatpush1.bf16.msra.mxu0 %v1446_v8  ;;  %v139_v24 = vld [vmem:[%s2292_s1 + $0x30] sm:$0xff]  ;;  %v1482_v26 = vpack.c.bf16 %v243_v20, %v242_v19  ;;  %v244_v29 = vld [vmem:[%s2292_s1 + $0xd8] sm:$0xff]  ;;  %v245_v30 = vld [vmem:[%s2292_s1 + $0xe0] sm:$0xff] }
   0x6   :  { %23 = vperm.xlu0 %1640, %v1628_v9   ;;  %v53_v12 = vadd.s32 17, %v1628_v9  ;;  %1448 = vmatprep.subr.bf16.mxu0 %v1682_v10  ;;  %v37_v16 = vadd.s32 10, %v1628_v9  ;;  %v69_v21 = vadd.s32 22, %v1628_v9  ;;  %v101_v28 = vadd.s32 142, %v1628_v9  ;;  %v141_v33 = vld [vmem:[%s2292_s1 + $0x40] sm:$0xff]  ;;  %v142_v34 = vld [vmem:[%s2292_s1 + $0x48] sm:$0xff] }
   0x7   :  { %1480 = vmatpush1.bf16.msra.mxu1 %v1479_v18  ;;  %v1455_v31 = vpack.c.bf16 %v140_v25, %v139_v24  ;;  %v85_v32 = vadd.s32 82, %v1628_v9  ;;  %v1485_v36 = vpack.c.bf16 %v245_v30, %v244_v29  ;;  %v246_v37 = vld [vmem:[%s2292_s1 + $0xe8] sm:$0xff]  ;;  %v247_v38 = vld [vmem:[%s2292_s1 + $0xf0] sm:$0xff]  ;;  %v1458_v40 = vpack.c.bf16 %v142_v34, %v141_v33  ;;  %v144_v42 = vld [vmem:[%s2292_s1 + $0x58] sm:$0xff] }
   0x8   :  { %55 = vperm.xlu1 %1642, %v53_v12   ;;  %1481 = vmatprep.subr.bf16.mxu1 %v1682_v10  ;;  %v143_v41 = vld [vmem:[%s2292_s1 + $0x50] sm:$0xff]  ;;  %v117_v43 = vadd.s32 202, %v1628_v9  ;;  %v1488_v44 = vpack.c.bf16 %v247_v38, %v246_v37  ;;  %v248_v45 = vld [vmem:[%s2292_s1 + $0xf8] sm:$0xff]  ;;  %v249_v46 = vld [vmem:[%s2292_s1 + $0x100] sm:$0xff] }
   0x9   :  { %1450 = vmatpush1.bf16.msra.mxu0 %v1449_v11  ;;  %v1461_v48 = vpack.c.bf16 %v144_v42, %v143_v41  ;;  %v145_v49 = vld [vmem:[%s2292_s1 + $0x60] sm:$0xff]  ;;  %v146_v50 = vld [vmem:[%s2292_s1 + $0x68] sm:$0xff]  ;;  %v1491_v51 = vpack.c.bf16 %v249_v46, %v248_v45  ;;  %v251_v53 = vld [vmem:[%s2292_s1 + $0x110] sm:$0xff] }
   0xa   :  { %1641 = vset.pattern.permute.xlu0 %v1683_v23  ;;  %1451 = vmatprep.subr.bf16.mxu0 %v1682_v10  ;;  %v250_v52 = vld [vmem:[%s2292_s1 + $0x108] sm:$0xff]  ;;  %v1464_v54 = vpack.c.bf16 %v146_v50, %v145_v49  ;;  %v147_v55 = vld [vmem:[%s2292_s1 + $0x70] sm:$0xff]  ;;  %v148_v56 = vld [vmem:[%s2292_s1 + $0x78] sm:$0xff] }
   0xb   :  { %39 = vperm.xlu0 %1641, %v37_v16   ;;  %1483 = vmatpush1.bf16.msra.mxu1 %v1482_v26  ;;  %v1494_v57 = vpack.c.bf16 %v251_v53, %v250_v52  ;;  %v252_v58 = vld [vmem:[%s2292_s1 + $0x118] sm:$0xff]  ;;  %v253_v59 = vld [vmem:[%s2292_s1 + $0x120] sm:$0xff]  ;;  %v1467_v60 = vpack.c.bf16 %v148_v56, %v147_v55 }
   0xc   :  { %1643 = vset.pattern.permute.xlu1 %v1684_v27  ;;  %1484 = vmatprep.subr.bf16.mxu1 %v1682_v10 }
   0xd   :  { %71 = vperm.xlu1 %1643, %v69_v21   ;;  %1453 = vmatpush1.bf16.msra.mxu0 %v1452_v22 }
   0xe   :  { %1454 = vmatprep.subr.bf16.mxu0 %v1682_v10 }
   0xf   :  { %1645 = vset.pattern.permute.xlu0 %v1685_v35  ;;  %1486 = vmatpush1.bf16.msra.mxu1 %v1485_v36 }
  0x10   :  { %103 = vperm.xlu0 %1645, %v101_v28   ;;  %1487 = vmatprep.subr.bf16.mxu1 %v1682_v10 }
  0x11   :  { %1644 = vset.pattern.permute.xlu1 %v1686_v39  ;;  %1456 = vmatpush1.bf16.msra.mxu0 %v1455_v31 }
  0x12   :  { %87 = vperm.xlu1 %1644, %v85_v32   ;;  %1457 = vmatprep.subr.bf16.mxu0 %v1682_v10 }
  0x13   :  { %1489 = vmatpush1.bf16.msra.mxu1 %v1488_v44 }
  0x14   :  { %1647 = vset.pattern.permute.xlu0 %v1687_v47  ;;  %1490 = vmatprep.subr.bf16.mxu1 %v1682_v10 }
  0x15   :  { %1459 = vmatpush1.bf16.msra.mxu0 %v1458_v40 }
  0x16   :  { %1646 = vset.pattern.permute.xlu1 %v1687_v47  ;;  %1460 = vmatprep.subr.bf16.mxu0 %v1682_v10 }
  0x17   :  { %119 = vperm.xlu1 %1646, %v117_v43   ;;  %1492 = vmatpush1.bf16.msra.mxu1 %v1491_v51 }
  0x18   :  { %1493 = vmatprep.subr.bf16.mxu1 %v1682_v10 }
  0x19   :  { %1462 = vmatpush1.bf16.msra.mxu0 %v1461_v48 }
  0x1a   :  { %1463 = vmatprep.subr.bf16.mxu0 %v1682_v10 }
  0x1d   :  { %1465 = vmatpush1.bf16.msra.mxu0 %v1464_v54 }
  0x1e   :  { %8 = vsyncpa [#allocation3], 0  ;;  %1466 = vmatprep.subr.bf16.mxu0 %v1682_v10  ;;  %v149_v61 = vld [vmem:[%s2292_s1 + $0x80] sm:$0xff]  ;;  %v150_v62 = vld [vmem:[%s2292_s1 + $0x88] sm:$0xff]  ;;  %1495 = vmatpush1.bf16.msra.mxu1 %v1494_v57  ;;  %v1497_v63 = vpack.c.bf16 %v253_v59, %v252_v58  ;;  %v1688_v25 = vmov 0.0   ;;  %vm165_vm1 = vcmask 1046528  }
  0x1f   :  { %1496 = vmatprep.subr.bf16.mxu1 %v1682_v10  ;;  %v254_v0 = vld [vmem:[%s2292_s1 + $0x128] sm:$0xff]  ;;  %v255_v1 = vld [vmem:[%s2292_s1 + $0x130] sm:$0xff]  ;;  %v1470_v2 = vpack.c.bf16 %v150_v62, %v149_v61  ;;  %v152_v4 = vld [vmem:[%s2292_s1 + $0x98] sm:$0xff]  ;;  %vm1689_vm2 = vmmov 0  }
  0x20   :  { %v151_v3 = vld [vmem:[%s2292_s1 + $0x90] sm:$0xff]  ;;  %v1500_v5 = vpack.c.bf16 %v255_v1, %v254_v0  ;;  %v256_v6 = vld [vmem:[%s2292_s1 + $0x138] sm:$0xff]  ;;  %v257_v7 = vld [vmem:[%s2292_s1 + $0x140] sm:$0xff] }
  0x21   :  { %1468 = vmatpush1.bf16.msra.mxu0 %v1467_v60  ;;  %v1473_v8 = vpack.c.bf16 %v152_v4, %v151_v3  ;;  %v153_v9 = vld [vmem:[%s2292_s1 + $0xa0] sm:$0xff]  ;;  %v154_v11 = vld [vmem:[%s2292_s1 + $0xa8] sm:$0xff]  ;;  %v1503_v12 = vpack.c.bf16 %v257_v7, %v256_v6  ;;  %v259_v14 = vld [vmem:[%s2292_s1 + $0x150] sm:$0xff] }
  0x22   :  { %1469 = vmatprep.subr.bf16.mxu0 %v1682_v10  ;;  %1498 = vmatpush1.bf16.msra.mxu1 %v1497_v63  ;;  %v258_v13 = vld [vmem:[%s2292_s1 + $0x148] sm:$0xff]  ;;  %v1476_v15 = vpack.c.bf16 %v154_v11, %v153_v9  ;;  %v358_v16 = vld [vmem:[%s2292_s1 + $0x1f0] sm:$0xff]  ;;  %v359_v17 = vld [vmem:[%s2292_s1 + $0x1f8] sm:$0xff]  ;;  %v17_v9 = vlaneseq }
  0x23   :  { %1499 = vmatprep.subr.bf16.mxu1 %v1682_v10  ;;  %v342_v18 = vld [vmem:[%s2292_s1 + $0x170] sm:$0xff]  ;;  %v1506_v19 = vpack.c.bf16 %v259_v14, %v258_v13  ;;  %v343_v20 = vld [vmem:[%s2292_s1 + $0x178] sm:$0xff]  ;;  %v261_v22 = vld [vmem:[%s2292_s1 + $0x160] sm:$0xff]  ;;  %v1511_v27 = vpack.c.bf16 %v359_v17, %v358_v16 }
  0x24   :  { %v260_v21 = vld [vmem:[%s2292_s1 + $0x158] sm:$0xff]  ;;  %v360_v23 = vld [vmem:[%s2292_s1 + $0x200] sm:$0xff]  ;;  %v361_v24 = vld [vmem:[%s2292_s1 + $0x208] sm:$0xff]  ;;  %v1513_v29 = vpack.c.bf16 %v343_v20, %v342_v18  ;;  %v1985_v11 = vand.u32 127, %v17_v9 }
  0x25   :  { %1471 = vmatpush1.bf16.msra.mxu0 %v1470_v2  ;;  %v155_v26 = vld [vmem:[%s2292_s1 + $0xb0] sm:$0x7f]  ;;  %v15_v28 = vld [vmem:[%s2291_s0] sm:$0xff]  ;;  %v1509_v30 = vpack.c.bf16 %v261_v22, %v260_v21  ;;  %v1515_v31 = vpack.c.bf16 %v361_v24, %v360_v23  ;;  %v345_v33 = vld [vmem:[%s2292_s1 + $0x188] sm:$0xff] }
  0x26   :  { %1472 = vmatprep.subr.bf16.mxu0 %v1682_v10  ;;  %1501 = vmatpush1.bf16.msra.mxu1 %v1500_v5  ;;  %v344_v32 = vld [vmem:[%s2292_s1 + $0x180] sm:$0xff]  ;;  %v362_v34 = vld [vmem:[%s2292_s1 + $0x210] sm:$0xff]  ;;  %v363_v35 = vld [vmem:[%s2292_s1 + $0x218] sm:$0xff]  ;;  %v1991_v13 = vadd.s32 256, %v1985_v11 }
  0x27   :  { %1502 = vmatprep.subr.bf16.mxu1 %v1682_v10  ;;  %v1517_v36 = vpack.c.bf16 %v345_v33, %v344_v32  ;;  %v1519_v37 = vpack.c.bf16 %v363_v35, %v362_v34  ;;  %v346_v38 = vld [vmem:[%s2292_s1 + $0x190] sm:$0xff]  ;;  %v347_v39 = vld [vmem:[%s2292_s1 + $0x198] sm:$0xff]  ;;  %v262_v40 = vld [vmem:[%s2292_s1 + $0x168] sm:$0x7f] }
  0x28   :  { %v364_v41 = vld [vmem:[%s2292_s1 + $0x220] sm:$0xff]  ;;  %v365_v42 = vld [vmem:[%s2292_s1 + $0x228] sm:$0xff]  ;;  %v1521_v43 = vpack.c.bf16 %v347_v39, %v346_v38  ;;  %v374_v44 = vld [vmem:[%s2292_s1 + $0x270] sm:$0xff] }
  0x29   :  { %1474 = vmatpush1.bf16.msra.mxu0 %v1473_v8  ;;  %v1523_v45 = vpack.c.bf16 %v365_v42, %v364_v41  ;;  %v348_v46 = vld [vmem:[%s2292_s1 + $0x1a0] sm:$0xff]  ;;  %v349_v47 = vld [vmem:[%s2292_s1 + $0x1a8] sm:$0xff]  ;;  %v366_v48 = vld [vmem:[%s2292_s1 + $0x230] sm:$0xff] }
  0x2a   :  { %1475 = vmatprep.subr.bf16.mxu0 %v1682_v10  ;;  %1504 = vmatpush1.bf16.msra.mxu1 %v1503_v12  ;;  %v367_v49 = vld [vmem:[%s2292_s1 + $0x238] sm:$0xff]  ;;  %v1525_v50 = vpack.c.bf16 %v349_v47, %v348_v46  ;;  %v350_v52 = vld [vmem:[%s2292_s1 + $0x1b0] sm:$0xff]  ;;  %v368_v54 = vld [vmem:[%s2292_s1 + $0x240] sm:$0xff]  ;;  %v1988_v12 = vadd.s32 128, %v1985_v11 }
  0x2b   :  { %1505 = vmatprep.subr.bf16.mxu1 %v1682_v10  ;;  %v1527_v51 = vpack.c.bf16 %v367_v49, %v366_v48  ;;  %v351_v53 = vld [vmem:[%s2292_s1 + $0x1b8] sm:$0xff]  ;;  %v369_v55 = vld [vmem:[%s2292_s1 + $0x248] sm:$0xff]  ;;  %v352_v58 = vld [vmem:[%s2292_s1 + $0x1c0] sm:$0xff] }
  0x2c   :  { %v1529_v56 = vpack.c.bf16 %v351_v53, %v350_v52  ;;  %v1531_v57 = vpack.c.bf16 %v369_v55, %v368_v54  ;;  %v353_v59 = vld [vmem:[%s2292_s1 + $0x1c8] sm:$0xff]  ;;  %v370_v60 = vld [vmem:[%s2292_s1 + $0x250] sm:$0xff]  ;;  %v371_v61 = vld [vmem:[%s2292_s1 + $0x258] sm:$0xff] }
  0x2d   :  { %1477 = vmatpush1.bf16.msra.mxu0 %v1476_v15  ;;  %v1533_v62 = vpack.c.bf16 %v353_v59, %v352_v58  ;;  %v1535_v63 = vpack.c.bf16 %v371_v61, %v370_v60  ;;  %v354_v0 = vld [vmem:[%s2292_s1 + $0x1d0] sm:$0xff]  ;;  %v355_v1 = vld [vmem:[%s2292_s1 + $0x1d8] sm:$0xff]  ;;  %v372_v2 = vld [vmem:[%s2292_s1 + $0x260] sm:$0xff] }
  0x2e   :  { %213 = vmatprep.subr.mxu0 %v1688_v25  ;;  %1507 = vmatpush1.bf16.msra.mxu1 %v1506_v19  ;;  %v373_v3 = vld [vmem:[%s2292_s1 + $0x268] sm:$0xff]  ;;  %v1537_v4 = vpack.c.bf16 %v355_v1, %v354_v0  ;;  %v356_v6 = vld [vmem:[%s2292_s1 + $0x1e0] sm:$0xff]  ;;  %v538_v61 = vld [vmem:[%s2292_s1 + $0x2b8] sm:$0xff] }
  0x2f   :  { %1508 = vmatprep.subr.bf16.mxu1 %v1682_v10  ;;  %v1539_v5 = vpack.c.bf16 %v373_v3, %v372_v2  ;;  %v357_v7 = vld [vmem:[%s2292_s1 + $0x1e8] sm:$0xff]  ;;  %v541_v1 = vld [vmem:[%s2292_s1 + $0x2d0] sm:$0xff]  ;;  %v542_v3 = vld [vmem:[%s2292_s1 + $0x2d8] sm:$0xff] }
  0x30   :  { %v1541_v8 = vpack.c.bf16 %v357_v7, %v356_v6  ;;  %v540_v0 = vld [vmem:[%s2292_s1 + $0x2c8] sm:$0xff]  ;;  %v545_v7 = vld [vmem:[%s2292_s1 + $0x2f0] sm:$0xff] }
  0x31   :  { %1184 = vmatpush1.msk.msra.mxu0 %vm165_vm1, %v155_v26  ;;  %v1547_v2 = vpack.c.bf16 %v541_v1, %v540_v0  ;;  %v544_v6 = vld [vmem:[%s2292_s1 + $0x2e8] sm:$0xff] }
  0x32   :  { %234 = vmatmul.mubr.f32.vlgmr.msra.gmra.mrb[0].mxu0 %v15_v28  ;;  %1512 = vmatprep.subr.bf16.mxu0 %v1511_v27 }
  0x33   :  { %1514 = vmatpush3.bf16.msra.mxu0 %v1513_v29  ;;  %1510 = vmatpush1.bf16.msra.mxu1 %v1509_v30 }
  0x34   :  { %1516 = vmatprep.subr.bf16.mxu0 %v1515_v31  ;;  %315 = vmatprep.subr.mxu1 %v1688_v25 }
  0x37   :  { %1518 = vmatpush3.bf16.msra.mxu0 %v1517_v36  ;;  %1187 = vmatpush1.msk.msra.mxu1 %vm165_vm1, %v262_v40 }
  0x38   :  { %1520 = vmatprep.subr.bf16.mxu0 %v1519_v37  ;;  %336 = vmatmul.mubr.f32.vlgmr.msra.gmra.mrb[0].mxu1 %v15_v28 }
  0x39   :  { %1307 = vmatprep.subr.mxu1 %v1688_v25  ;;  %1309 = vmatprep.mubr.msk.f32.mxu1 %vm1689_vm2, %v1688_v25 }
  0x3a   :  { %1308 = vmatpush3.msra.mxu1 %v374_v44 }
  0x3b   :  { %1522 = vmatpush3.bf16.msra.mxu0 %v1521_v43  ;;  %1543 = vmatprep.subr.bf16.mxu1 %v1682_v10 }
  0x3c   :  { %1524 = vmatprep.subr.bf16.mxu0 %v1523_v45 }
  0x3f   :  { %1526 = vmatpush3.bf16.msra.mxu0 %v1525_v50 }
  0x40   :  { %1528 = vmatprep.subr.bf16.mxu0 %v1527_v51 }
  0x43   :  { %1530 = vmatpush3.bf16.msra.mxu0 %v1529_v56 }
  0x44   :  { %1532 = vmatprep.subr.bf16.mxu0 %v1531_v57 }
  0x47   :  { %1534 = vmatpush3.bf16.msra.mxu0 %v1533_v62  ;;  %v539_v62 = vld [vmem:[%s2292_s1 + $0x2c0] sm:$0xff] }
  0x48   :  { %1536 = vmatprep.subr.bf16.mxu0 %v1535_v63  ;;  %v1544_v63 = vpack.c.bf16 %v539_v62, %v538_v61  ;;  %v894_v61 = vld [vmem:[%s2292_s1 + $0x3b8] sm:$0xff]  ;;  %v895_v62 = vld [vmem:[%s2292_s1 + $0x3c0] sm:$0xff] }
  0x49   :  { %v1592_v0 = vpack.c.bf16 %v895_v62, %v894_v61 }
  0x4b   :  { %1538 = vmatpush3.bf16.msra.mxu0 %v1537_v4  ;;  %v543_v4 = vld [vmem:[%s2292_s1 + $0x2e0] sm:$0xff] }
  0x4c   :  { %1540 = vmatprep.subr.bf16.mxu0 %v1539_v5  ;;  %v1550_v5 = vpack.c.bf16 %v543_v4, %v542_v3  ;;  %v897_v3 = vld [vmem:[%s2292_s1 + $0x3d0] sm:$0xff] }
  0x4f   :  { %1542 = vmatpush3.bf16.msra.mxu0 %v1541_v8  ;;  %v1553_v8 = vpack.c.bf16 %v545_v7, %v544_v6  ;;  %v899_v6 = vld [vmem:[%s2292_s1 + $0x3e0] sm:$0xff] }
  0x50   :  { %1567 = vmatprep.subr.bf16.mxu0 %v1682_v10 }
  0x85   :  { %v24_v14 = vpop.permute.xlu0 %23 }
  0x86   :  { %vm25_vm3 = vcmp.eq.s32.totalorder %v1985_v11, %v24_v14  ;;  %vm26_vm4 = vcmp.eq.s32.totalorder %v1988_v12, %v24_v14  ;;  %vm27_vm5 = vcmp.eq.s32.totalorder %v1991_v13, %v24_v14 }
  0x87   :  { %v56_v15 = vpop.permute.xlu1 %55  ;;  %v1162_v16 = vsel %vm25_vm3, 1.0, %v1688_v25  ;;  %v1163_v17 = vsel %vm26_vm4, 1.0, %v1688_v25  ;;  %v1164_v18 = vsel %vm27_vm5, 1.0, %v1688_v25 }
  0x88   :  { %vm57_vm6 = vcmp.eq.s32.totalorder %v1985_v11, %v56_v15  ;;  %vm58_vm7 = vcmp.eq.s32.totalorder %v1988_v12, %v56_v15  ;;  %vm59_vm8 = vcmp.eq.s32.totalorder %v1991_v13, %v56_v15 }
  0x89   :  { %v1168_v20 = vsel %vm57_vm6, 1.0, %v1688_v25  ;;  %v1169_v21 = vsel %vm58_vm7, 1.0, %v1688_v25  ;;  %v1170_v30 = vsel %vm59_vm8, 1.0, %v1688_v25 }
  0x8a   :  { %v40_v19 = vpop.permute.xlu0 %39 }
  0x8b   :  { %vm41_vm9 = vcmp.eq.s32.totalorder %v1985_v11, %v40_v19  ;;  %vm42_vm10 = vcmp.eq.s32.totalorder %v1988_v12, %v40_v19  ;;  %vm43_vm11 = vcmp.eq.s32.totalorder %v1991_v13, %v40_v19 }
  0x8c   :  { %v1165_v22 = vsel %vm41_vm9, 1.0, %v1688_v25  ;;  %v1166_v23 = vsel %vm42_vm10, 1.0, %v1688_v25  ;;  %v1167_v24 = vsel %vm43_vm11, 1.0, %v1688_v25  ;;  %v72_v26 = vpop.permute.xlu1 %71  ;;  %vm380_vm9 = vcmask 64512  }
  0x8d   :  { %v50_v27 = vadd.f32 %v1165_v22, %v1162_v16  ;;  %v51_v28 = vadd.f32 %v1166_v23, %v1163_v17  ;;  %v52_v29 = vadd.f32 %v1167_v24, %v1164_v18  ;;  %vm73_vm12 = vcmp.eq.s32.totalorder %v1985_v11, %v72_v26  ;;  %v1189_v17 = vld [vmem:[%s2293_s2 + $0x2] ss:$0 sm:$0xff]  ;;  %v530_v24 = vld [vmem:[%s2292_s1 + $0x278] sm:$0xff] }
  0x8e   :  { %vm74_vm13 = vcmp.eq.s32.totalorder %v1988_v12, %v72_v26  ;;  %vm75_vm14 = vcmp.eq.s32.totalorder %v1991_v13, %v72_v26  ;;  %v1171_v31 = vsel %vm73_vm12, 1.0, %v1688_v25  ;;  %v531_v26 = vld [vmem:[%s2292_s1 + $0x280] sm:$0xff]  ;;  %vm546_vm10 = vcmask 523264  }
  0x8f   :  { %v66_v32 = vadd.f32 %v1168_v20, %v50_v27  ;;  %v67_v33 = vadd.f32 %v1169_v21, %v51_v28  ;;  %v68_v34 = vadd.f32 %v1170_v30, %v52_v29  ;;  %v1172_v35 = vsel %vm74_vm13, 1.0, %v1688_v25  ;;  %v104_v36 = vpop.permute.xlu0 %103  ;;  %v532_v30 = vld [vmem:[%s2292_s1 + $0x288] sm:$0xff] }
  0x90   :  { %v1173_v37 = vsel %vm75_vm14, 1.0, %v1688_v25  ;;  %vm105_vm15 = vcmp.eq.s32.totalorder %v1985_v11, %v104_v36  ;;  %vm106_vm0 = vcmp.eq.s32.totalorder %v1988_v12, %v104_v36  ;;  %vm107_vm1 = vcmp.eq.s32.totalorder %v1991_v13, %v104_v36 }
  0x91   :  { %v82_v38 = vadd.f32 %v1171_v31, %v66_v32  ;;  %v83_v39 = vadd.f32 %v1172_v35, %v67_v33  ;;  %v84_v40 = vadd.f32 %v1173_v37, %v68_v34  ;;  %v88_v41 = vpop.permute.xlu1 %87  ;;  %v1177_v42 = vsel %vm105_vm15, 1.0, %v1688_v25  ;;  %v533_v31 = vld [vmem:[%s2292_s1 + $0x290] sm:$0xff]  ;;  %v534_v34 = vld [vmem:[%s2292_s1 + $0x298] sm:$0xff]  ;;  %v535_v35 = vld [vmem:[%s2292_s1 + $0x2a0] sm:$0xff] }
  0x92   :  { %vm89_vm3 = vcmp.eq.s32.totalorder %v1985_v11, %v88_v41  ;;  %vm90_vm4 = vcmp.eq.s32.totalorder %v1988_v12, %v88_v41  ;;  %vm91_vm5 = vcmp.eq.s32.totalorder %v1991_v13, %v88_v41  ;;  %v1178_v43 = vsel %vm106_vm0, 1.0, %v1688_v25  ;;  %v536_v37 = vld [vmem:[%s2292_s1 + $0x2a8] sm:$0xff] }
  0x93   :  { %v1174_v44 = vsel %vm89_vm3, 1.0, %v1688_v25  ;;  %v1175_v45 = vsel %vm90_vm4, 1.0, %v1688_v25  ;;  %v1176_v46 = vsel %vm91_vm5, 1.0, %v1688_v25  ;;  %v1179_v47 = vsel %vm107_vm1, 1.0, %v1688_v25 }
  0x94   :  { %v98_v48 = vadd.f32 %v1174_v44, %v82_v38  ;;  %v99_v49 = vadd.f32 %v1175_v45, %v83_v39  ;;  %v100_v50 = vadd.f32 %v1176_v46, %v84_v40  ;;  %v1556_v29 = vpack.c.bf16 %v531_v26, %v530_v24  ;;  %v537_v38 = vld [vmem:[%s2292_s1 + $0x2b0] sm:$0xff]  ;;  %v1183_v39 = vld [vmem:[%s2293_s2] ss:$0 sm:$0xff]  ;;  %v702_v45 = vld [vmem:[%s2292_s1 + $0x308] sm:$0xff] }
  0x95   :  { %v1559_v33 = vpack.c.bf16 %v533_v31, %v532_v30  ;;  %v1562_v36 = vpack.c.bf16 %v535_v35, %v534_v34  ;;  %v1565_v40 = vpack.c.bf16 %v537_v38, %v536_v37  ;;  %v701_v44 = vld [vmem:[%s2292_s1 + $0x300] sm:$0xff]  ;;  %v798_v24 = vld [vmem:[%s2292_s1 + $0x368] sm:$0xff]  ;;  %v799_v26 = vld [vmem:[%s2292_s1 + $0x370] sm:$0xff] }
  0x96   :  { %v114_v51 = vadd.f32 %v1177_v42, %v98_v48  ;;  %v115_v52 = vadd.f32 %v1178_v43, %v99_v49  ;;  %v116_v53 = vadd.f32 %v1179_v47, %v100_v50  ;;  %v120_v54 = vpop.permute.xlu1 %119  ;;  %v700_v43 = vld [vmem:[%s2292_s1 + $0x2f8] sm:$0xff]  ;;  %v703_v47 = vld [vmem:[%s2292_s1 + $0x310] sm:$0xff]  ;;  %v705_v50 = vld [vmem:[%s2292_s1 + $0x320] sm:$0xff] }
  0x97   :  { %vm121_vm6 = vcmp.eq.s32.totalorder %v1985_v11, %v120_v54  ;;  %vm122_vm7 = vcmp.eq.s32.totalorder %v1988_v12, %v120_v54  ;;  %vm123_vm8 = vcmp.eq.s32.totalorder %v1991_v13, %v120_v54  ;;  %v1568_v46 = vpack.c.bf16 %v701_v44, %v700_v43  ;;  %v704_v49 = vld [vmem:[%s2292_s1 + $0x318] sm:$0xff] }
  0x98   :  { %v1180_v55 = vsel %vm121_vm6, 1.0, %v1688_v25  ;;  %v1181_v56 = vsel %vm122_vm7, 1.0, %v1688_v25  ;;  %v1182_v57 = vsel %vm123_vm8, 1.0, %v1688_v25  ;;  %v1571_v48 = vpack.c.bf16 %v703_v47, %v702_v45  ;;  %v890_v44 = vld [vmem:[%s2292_s1 + $0x398] sm:$0xff]  ;;  %v891_v45 = vld [vmem:[%s2292_s1 + $0x3a0] sm:$0xff]  ;;  %v892_v47 = vld [vmem:[%s2292_s1 + $0x3a8] sm:$0xff] }
  0x99   :  { %v130_v58 = vadd.f32 %v1180_v55, %v114_v51  ;;  %v131_v59 = vadd.f32 %v1181_v56, %v115_v52  ;;  %v132_v60 = vadd.f32 %v1182_v57, %v116_v53  ;;  %v1574_v51 = vpack.c.bf16 %v705_v50, %v704_v49  ;;  %v706_v52 = vld [vmem:[%s2292_s1 + $0x328] sm:$0xff]  ;;  %v707_v53 = vld [vmem:[%s2292_s1 + $0x330] sm:$0xff]  ;;  %v1055_v50 = vld [vmem:[%s2292_s1 + $0x3f8] sm:$0xff] }
  0x9a   :  { %v1577_v54 = vpack.c.bf16 %v707_v53, %v706_v52  ;;  %v1057_v52 = vld [vmem:[%s2292_s1 + $0x408] sm:$0xff] }
  0x9b   :  { %448 = vmatprep.mubr.f32.mxu0 %v131_v59  ;;  %1310 = vmatmul.mubr.msk.f32.vlgmr.msra.gmra.mrb[2].mxu1 %vm380_vm9, %v132_v60 }
  0x9c   :  { %449 = vmatmul.mubr.f32.vlgmr.msra.gmra.mrb[2].mxu0 %v130_v58  ;;  %1328 = vmatprep.mubr.msk.f32.mxu1 %vm1689_vm2, %v1688_v25  ;;  %v1194_v58 = vld [vmem:[%s2293_s2 + $0x3] ss:$0 sm:$0xff] }
  0x9d   :  { %1366 = vmatprep.mubr.msk.f32.mxu0 %vm1689_vm2, %v1688_v25  ;;  %1545 = vmatpush3.bf16.msra.mxu1 %v1544_v63 }
  0x9e   :  { %1546 = vmatprep.subr.bf16.mxu1 %v1682_v10  ;;  %1569 = vmatpush3.bf16.msra.mxu0 %v1568_v46  ;;  %v1610_v46 = vpack.c.bf16 %v891_v45, %v890_v44 }
  0x9f   :  { %1570 = vmatprep.subr.bf16.mxu0 %v1682_v10 }
  0xa1   :  { %1548 = vmatpush3.bf16.msra.mxu1 %v1547_v2  ;;  %v896_v2 = vld [vmem:[%s2292_s1 + $0x3c8] sm:$0xff] }
  0xa2   :  { %1549 = vmatprep.subr.bf16.mxu1 %v1682_v10  ;;  %1572 = vmatpush3.bf16.msra.mxu0 %v1571_v48  ;;  %v1595_v4 = vpack.c.bf16 %v897_v3, %v896_v2  ;;  %v893_v48 = vld [vmem:[%s2292_s1 + $0x3b0] sm:$0xff]  ;;  %v1059_v3 = vld [vmem:[%s2292_s1 + $0x418] sm:$0xff] }
  0xa3   :  { %1573 = vmatprep.subr.bf16.mxu0 %v1682_v10  ;;  %v1613_v49 = vpack.c.bf16 %v893_v48, %v892_v47 }
  0xa5   :  { %1551 = vmatpush3.bf16.msra.mxu1 %v1550_v5  ;;  %v898_v5 = vld [vmem:[%s2292_s1 + $0x3d8] sm:$0xff] }
  0xa6   :  { %1552 = vmatprep.subr.bf16.mxu1 %v1682_v10  ;;  %1575 = vmatpush3.bf16.msra.mxu0 %v1574_v51  ;;  %v1598_v7 = vpack.c.bf16 %v899_v6, %v898_v5  ;;  %v1056_v51 = vld [vmem:[%s2292_s1 + $0x400] sm:$0xff]  ;;  %v1061_v6 = vld [vmem:[%s2292_s1 + $0x428] sm:$0xff] }
  0xa7   :  { %1576 = vmatprep.subr.bf16.mxu0 %v1682_v10  ;;  %v1616_v53 = vpack.c.bf16 %v1056_v51, %v1055_v50 }
  0xa9   :  { %1554 = vmatpush3.bf16.msra.mxu1 %v1553_v8  ;;  %v900_v8 = vld [vmem:[%s2292_s1 + $0x3e8] sm:$0xff] }
  0xaa   :  { %1555 = vmatprep.subr.bf16.mxu1 %v1682_v10  ;;  %1578 = vmatpush3.bf16.msra.mxu0 %v1577_v54  ;;  %v1058_v54 = vld [vmem:[%s2292_s1 + $0x410] sm:$0xff] }
  0xab   :  { %1591 = vmatprep.subr.bf16.mxu0 %v1682_v10 }
 0x105   :  { %v235_v9 = vpop.f32.mrb[0].mxu0 }
 0x106   :  { %v237_v11 = vpop.f32.mrb[1].mxu0  ;;  %v236_v41 = vadd.f32 %v1183_v39, %v235_v9  ;;  %v901_v9 = vld [vmem:[%s2292_s1 + $0x3f0] sm:$0xff]  ;;  %v886_v39 = vld [vmem:[%s2292_s1 + $0x378] sm:$0xff] }
 0x107   :  { %v1186_v11 = vld [vmem:[%s2293_s2 + $0x1] ss:$0 sm:$0xff] }
 0x108   :  { %v239_v42 = vmax.f32 %v236_v41, 0.0 }
 0x10b   :  { %v2068_v12 = vpop.f32.mrb[0].mxu1 }
 0x10c   :  { %v339_v13 = vpop.f32.mrb[1].mxu1 }
 0x10d   :  { %v1601_v13 = vpack.c.bf16 %v901_v9, %v900_v8 }
 0x16e   :  { %v520_v14 = vpop.f32.mrb[2].mxu1 }
 0x16f   :  { %v1239_v15 = vpop.f32.mrb[2].mxu0  ;;  %v1311_v16 = vpop.f32.mrb[3].mxu1 }
 0x170   :  { %v1240_v18 = vpop.f32.mrb[3].mxu0  ;;  %v792_v16 = vld [vmem:[%s2292_s1 + $0x338] sm:$0xff] }
 0x171   :  { %v1241_v19 = vadd.f32 %v1240_v18, %v1239_v15  ;;  %v794_v18 = vld [vmem:[%s2292_s1 + $0x348] sm:$0xff] }
 0x173   :  { %v451_v20 = vadd.f32 %v1241_v19, %v1189_v17  ;;  %v793_v17 = vld [vmem:[%s2292_s1 + $0x340] sm:$0xff]  ;;  %v795_v19 = vld [vmem:[%s2292_s1 + $0x350] sm:$0xff] }
 0x175   :  { %v521_v21 = vadd.f32 %v520_v14, %v451_v20  ;;  %v338_v14 = vadd.f32 %v1186_v11, %v2068_v12  ;;  %v1580_v12 = vpack.c.bf16 %v793_v17, %v792_v16  ;;  %v1583_v20 = vpack.c.bf16 %v795_v19, %v794_v18  ;;  %v1203_v11 = vld [vmem:[%s2293_s2 + $0x6] ss:$0 sm:$0xff] }
 0x177   :  { %v525_v22 = vmin.f32 %v521_v21, 0.0  ;;  %vm524_vm11 = vcmp.gt.f32.partialorder %v521_v21, 0.0  ;;  %v341_v15 = vmax.f32 %v338_v14, 0.0 }
 0x179   :  { %v526_v23 = vmul.f32 1.442695, %v525_v22  ;;  %v797_v22 = vld [vmem:[%s2292_s1 + $0x360] sm:$0xff] }
 0x17b   :  { %1648 = vpow2.f32 %v526_v23 }
 0x185   :  { %v1649_v27 = vpop.eup %1648 }
 0x186   :  { %v1191_v28 = vadd.f32 -1.0, %v1649_v27  ;;  %v1589_v27 = vpack.c.bf16 %v799_v26, %v798_v24 }
 0x188   :  { %v529_v32 = vsel %vm524_vm11, %v521_v21, %v1191_v28  ;;  %v796_v21 = vld [vmem:[%s2292_s1 + $0x358] sm:$0xff]  ;;  %v1195_v28 = vld [vmem:[%s2293_s2 + $0x4] ss:$0 sm:$0xff] }
 0x189   :  { %1329 = vmatmul.mubr.msk.f32.vlgmr.msra.gmra.mrb[4].mxu1 %vm546_vm10, %v529_v32  ;;  %v1586_v23 = vpack.c.bf16 %v797_v22, %v796_v21 }
 0x18a   :  { %1557 = vmatpush3.bf16.msra.mxu1 %v1556_v29  ;;  %1347 = vmatprep.mubr.msk.f32.mxu1 %vm1689_vm2, %v1688_v25 }
 0x18b   :  { %1558 = vmatprep.subr.bf16.mxu1 %v1682_v10 }
 0x18e   :  { %1560 = vmatpush3.bf16.msra.mxu1 %v1559_v33 }
 0x18f   :  { %1561 = vmatprep.subr.bf16.mxu1 %v1682_v10 }
 0x192   :  { %1563 = vmatpush3.bf16.msra.mxu1 %v1562_v36 }
 0x193   :  { %1564 = vmatprep.subr.bf16.mxu1 %v1682_v10 }
 0x196   :  { %1566 = vmatpush3.bf16.msra.mxu1 %v1565_v40  ;;  %v887_v40 = vld [vmem:[%s2292_s1 + $0x380] sm:$0xff] }
 0x197   :  { %1579 = vmatprep.subr.bf16.mxu1 %v1682_v10  ;;  %v1604_v41 = vpack.c.bf16 %v887_v40, %v886_v39 }
 0x199   :  { %1348 = vmatmul.mubr.msk.f32.vlgmr.msra.gmra.mrb[6].mxu1 %vm546_vm10, %v239_v42  ;;  %v888_v42 = vld [vmem:[%s2292_s1 + $0x388] sm:$0xff] }
 0x19a   :  { %1385 = vmatprep.mubr.msk.f32.mxu1 %vm1689_vm2, %v1688_v25  ;;  %1581 = vmatpush3.bf16.msra.mxu1 %v1580_v12 }
 0x19b   :  { %1582 = vmatprep.subr.bf16.mxu1 %v1682_v10 }
 0x19e   :  { %1584 = vmatpush3.bf16.msra.mxu1 %v1583_v20 }
 0x19f   :  { %1585 = vmatprep.subr.bf16.mxu1 %v1682_v10 }
 0x1a2   :  { %1587 = vmatpush3.bf16.msra.mxu1 %v1586_v23 }
 0x1a3   :  { %1588 = vmatprep.subr.bf16.mxu1 %v1682_v10 }
 0x1a6   :  { %1590 = vmatpush3.bf16.msra.mxu1 %v1589_v27 }
 0x1a7   :  { %1603 = vmatprep.subr.bf16.mxu1 %v1682_v10 }
 0x25c   :  { %v616_v55 = vpop.f32.mrb[4].mxu1 }
 0x25d   :  { %v1330_v56 = vpop.f32.mrb[5].mxu1 }
 0x25e   :  { %v1198_v56 = vld [vmem:[%s2293_s2 + $0x5] ss:$0 sm:$0xff] }
 0x26c   :  { %v689_v57 = vpop.f32.mrb[6].mxu1 }
 0x26d   :  { %v690_v59 = vadd.f32 %v689_v57, %v616_v55  ;;  %v1349_v60 = vpop.f32.mrb[7].mxu1  ;;  %v1619_v55 = vpack.c.bf16 %v1058_v54, %v1057_v52 }
 0x26f   :  { %v698_v63 = vadd.f32 %v1194_v58, %v690_v59 }
 0x271   :  { %v699_v1 = vmax.f32 %v698_v63, 0.0 }
 0x273   :  { %1367 = vmatmul.mubr.msk.f32.vlgmr.msra.gmra.mrb[4].mxu0 %vm546_vm10, %v699_v1 }
 0x274   :  { %1593 = vmatpush3.bf16.msra.mxu0 %v1592_v0  ;;  %1404 = vmatprep.mubr.msk.f32.mxu0 %vm1689_vm2, %v1688_v25 }
 0x275   :  { %1594 = vmatprep.subr.bf16.mxu0 %v1682_v10 }
 0x278   :  { %1596 = vmatpush3.bf16.msra.mxu0 %v1595_v4  ;;  %v1060_v4 = vld [vmem:[%s2292_s1 + $0x420] sm:$0xff] }
 0x279   :  { %1597 = vmatprep.subr.bf16.mxu0 %v1682_v10  ;;  %v1622_v5 = vpack.c.bf16 %v1060_v4, %v1059_v3 }
 0x27c   :  { %1599 = vmatpush3.bf16.msra.mxu0 %v1598_v7  ;;  %v1062_v7 = vld [vmem:[%s2292_s1 + $0x430] sm:$0xff] }
 0x27d   :  { %1600 = vmatprep.subr.bf16.mxu0 %v1682_v10  ;;  %v1625_v8 = vpack.c.bf16 %v1062_v7, %v1061_v6 }
 0x280   :  { %1602 = vmatpush3.bf16.msra.mxu0 %v1601_v13 }
 0x281   :  { %1615 = vmatprep.subr.bf16.mxu0 %v1682_v10 }
 0x283   :  { %1405 = vmatmul.mubr.msk.f32.vlgmr.msra.gmra.mrb[6].mxu0 %vm546_vm10, %v341_v15 }
 0x284   :  { %1442 = vmatprep.mubr.msk.f32.mxu0 %vm1689_vm2, %v1688_v25  ;;  %1617 = vmatpush3.bf16.msra.mxu0 %v1616_v53 }
 0x285   :  { %1618 = vmatprep.subr.bf16.mxu0 %v1682_v10 }
 0x288   :  { %1620 = vmatpush3.bf16.msra.mxu0 %v1619_v55 }
 0x289   :  { %1621 = vmatprep.subr.bf16.mxu0 %v1682_v10 }
 0x28c   :  { %1623 = vmatpush3.bf16.msra.mxu0 %v1622_v5 }
 0x28d   :  { %1624 = vmatprep.subr.bf16.mxu0 %v1682_v10 }
 0x290   :  { %1626 = vmatpush3.bf16.msra.mxu0 %v1625_v8 }
 0x346   :  { %v782_v29 = vpop.f32.mrb[4].mxu0 }
 0x347   :  { %v783_v30 = vadd.f32 %v1195_v28, %v782_v29  ;;  %v1368_v31 = vpop.f32.mrb[5].mxu0 }
 0x349   :  { %v787_v32 = vmin.f32 %v783_v30, 0.0  ;;  %vm786_vm12 = vcmp.gt.f32.partialorder %v783_v30, 0.0 }
 0x34b   :  { %v788_v33 = vmul.f32 1.442695, %v787_v32 }
 0x34d   :  { %1650 = vpow2.f32 %v788_v33 }
 0x356   :  { %v971_v34 = vpop.f32.mrb[6].mxu0 }
 0x357   :  { %v1651_v35 = vpop.eup %1650  ;;  %v1406_v36 = vpop.f32.mrb[7].mxu0 }
 0x358   :  { %v1197_v37 = vadd.f32 -1.0, %v1651_v35 }
 0x35a   :  { %v791_v38 = vsel %vm786_vm12, %v783_v30, %v1197_v37 }
 0x35b   :  { %1386 = vmatmul.mubr.msk.f32.vlgmr.msra.gmra.mrb[8].mxu1 %vm546_vm10, %v791_v38 }
 0x35c   :  { %1423 = vmatprep.mubr.msk.f32.mxu1 %vm1689_vm2, %v1688_v25  ;;  %1605 = vmatpush3.bf16.msra.mxu1 %v1604_v41  ;;  %v889_v25 = vld [vmem:[%s2292_s1 + $0x390] sm:$0xff]  ;;  %s1690_s1 = smov [#allocation2]  }
 0x35d   :  { %1606 = vmatprep.subr.bf16.mxu1 %v1682_v10  ;;  %v1607_v43 = vpack.c.bf16 %v889_v25, %v888_v42  ;;  %s1154_s25 = sshll.u32 %s1690_s1, 4  ;;  %s1155_s25 = int_to_ptr.vmem [resolvable:$true] %s1154_s25 }
 0x35e   :  { %s1656_s26 = scalar_lea.vmem %s1155_s25, 128  ;;  %p1661_p1 = scmp.lt.s32.totalorder %s1155_s25, %s1155_s25 }
 0x35f   :  { %p1657_p0 = scmp.ne.s32.totalorder %s1155_s25, %s1656_s26  ;;  %p1662_p2 = scmp.lt.s32.totalorder %s1656_s26, %s1656_s26 }
 0x360   :  { %1608 = vmatpush3.bf16.msra.mxu1 %v1607_v43 }
 0x361   :  { %1609 = vmatprep.subr.bf16.mxu1 %v1682_v10  ;;  %p1663_p3 = por %p1662_p2, %p1661_p1 }
 0x363   :  { %p1664_p4 = pnand %p1663_p3, %p1657_p0 }
 0x364   :  { %1611 = vmatpush3.bf16.msra.mxu1 %v1610_v46 }
 0x365   :  { %1612 = vmatprep.subr.bf16.mxu1 %v1682_v10  ;;  %v1204_v10 = vld [vmem:[%s2293_s2 + $0x7] ss:$0 sm:$0xff] }
 0x368   :  { %1614 = vmatpush3.bf16.msra.mxu1 %v1613_v49 }
 0x42e   :  { %v874_v57 = vpop.f32.mrb[8].mxu1 }
 0x42f   :  { %v875_v58 = vadd.f32 %v1198_v56, %v874_v57  ;;  %v1387_v59 = vpop.f32.mrb[9].mxu1 }
 0x431   :  { %v879_v60 = vmin.f32 %v875_v58, 0.0  ;;  %vm878_vm2 = vcmp.gt.f32.partialorder %v875_v58, 0.0 }
 0x433   :  { %v880_v61 = vmul.f32 1.442695, %v879_v60 }
 0x435   :  { %1652 = vpow2.f32 %v880_v61 }
 0x43f   :  { %v1653_v62 = vpop.eup %1652 }
 0x440   :  { %v1200_v63 = vadd.f32 -1.0, %v1653_v62 }
 0x442   :  { %v883_v0 = vmul.f32 1.6732632, %v1200_v63 }
 0x444   :  { %v884_v1 = vsel %vm878_vm2, %v875_v58, %v883_v0 }
 0x445   :  { %v885_v2 = vmul.f32 1.050701, %v884_v1 }
 0x447   :  { %1424 = vmatmul.mubr.msk.f32.vlgmr.msra.gmra.mrb[10].mxu1 %vm546_vm10, %v885_v2 }
 0x51a   :  { %v1044_v9 = vpop.f32.mrb[10].mxu1 }
 0x51b   :  { %v1045_v13 = vadd.f32 %v1044_v9, %v971_v34  ;;  %v1425_v14 = vpop.f32.mrb[11].mxu1 }
 0x51d   :  { %v1053_v15 = vadd.f32 %v1203_v11, %v1045_v13 }
 0x51f   :  { %v1054_v16 = vmax.f32 %v1053_v15, 0.0 }
 0x521   :  { %1443 = vmatmul.mubr.msk.f32.vlgmr.msra.gmra.mrb[8].mxu0 %vm546_vm10, %v1054_v16 }
 0x5f4   :  { %v1137_v17 = vpop.f32.mrb[8].mxu0 }
 0x5f5   :  { %v1138_v12 = vadd.f32 %v1204_v10, %v1137_v17  ;;  %v1444_v18 = vpop.f32.mrb[9].mxu0 }
 0x5f7   :  { %v1142_v19 = vmin.f32 %v1138_v12, 0.0  ;;  %vm1141_vm13 = vcmp.gt.f32.partialorder %v1138_v12, 0.0 }
 0x5f9   :  { %v1143_v20 = vmul.f32 1.442695, %v1142_v19 }
 0x5fb   :  { %1654 = vpow2.f32 %v1143_v20 }
 0x605   :  { %v1655_v21 = vpop.eup %1654 }
 0x606   :  { %v1206_v22 = vadd.f32 -1.0, %v1655_v21 }
 0x608   :  { %v1146_v23 = vsel %vm1141_vm13, %v1138_v12, %v1206_v22 }
 0x609   :  { %1147 = vst.msk [vmem:[#allocation2] sm:$0xff] %vm380_vm9, %v1146_v23 }
 0x60a   :  { %1667 = shalt.err (!%p1664_p4)
}
 0x60b   :  { %s1668_s28 = scalar_lea.hbm %s2294_s3, 128 }
 0x60c   :  { %p1669_p5 = scmp.ne.s32.totalorder %s2294_s3, %s1668_s28  ;;  %p1672_p6 = scmp.lt.u32.totalorder %s1668_s28, %s2294_s3 }
 0x60e   :  { %p1674_p7 = pnand %p1672_p6, %p1669_p5 }
 0x610   :  { %1677 = shalt.err (!%p1674_p7)
}
 0x611   :  { %1157 = dma.vmem_to_hbm [thread:$0]  %s1155_s25, 128, %s2294_s3, [#allocation3]  }
 0x612   :  { %1678 = dma.done.wait [#allocation3], 128  }
 0x613   :  { %1679 = vsyncadd [#allocation3], 4294967168 }
 0x614   :  { %1161 = vsyncpa [#allocation3], 1 }

</bundles_post_ra>
